<compile_context>
chip_gen: v6e
topology: v6e:2x2x1
jax: 0.10.0
libtpu: 0.0.40
codegen_flags: <defaults>
</compile_context>

<pallas_src>
import functools

import jax
import jax.numpy as jnp
from jax.experimental import pallas as pl
from jax.experimental.pallas import tpu as pltpu


def _cdiv(a, b):
    return (a + b - 1) // b


def _round_up(x, m):
    return _cdiv(x, m) * m


def _patch_embed_kernel(x_ref, w_ref, b_ref, o_ref):
    # (tile_m, K) @ (K, N) on the MXU with f32 accumulation, + bias.
    acc = jnp.dot(x_ref[...], w_ref[...], preferred_element_type=jnp.float32)
    o_ref[...] = (acc + b_ref[...]).astype(o_ref.dtype)


@functools.partial(
    jax.jit,
    static_argnames=("patch_size", "compute_dtype", "out_dtype", "tile_m"))
def patch_embed(x, weight, bias, *, patch_size,
                compute_dtype=jnp.bfloat16, out_dtype=jnp.float32,
                tile_m=512):
    """Pallas PatchEmbed forward.

    Args:
      x:      (B, C, H, W) float32 image, NCHW like PyTorch.
      weight: (embed_dim, C, ph, pw) Conv2d weight (PyTorch layout).
      bias:   (embed_dim,) Conv2d bias.
      patch_size: (ph, pw).
      compute_dtype: MXU input dtype (bf16 on v5e/v6e/v7x; f32 accumulation).
      out_dtype: output dtype (f32 matches PyTorch; bf16 halves output HBM).
      tile_m: requested rows of the output computed per grid step.

    Returns:
      (B, Ho*Wo, embed_dim) in out_dtype.
    """
    B, C, H, W = x.shape
    ph, pw = patch_size
    assert H % ph == 0 and W % pw == 0
    Ho, Wo = H // ph, W // pw
    N = weight.shape[0]
    K = C * ph * pw
    M = B * Ho * Wo

    # Single fused im2col + bf16-downcast pass over x (jitted -> one XLA copy).
    patches = x.reshape(B, C, Ho, ph, Wo, pw)
    patches = patches.transpose(0, 2, 4, 1, 3, 5)          # (B,Ho,Wo,C,ph,pw)
    patches = patches.reshape(M, K).astype(compute_dtype)   # (M, K), no pad

    # Tiny weight / bias reorder (K order (c, kh, kw) matches im2col).
    w_mat = weight.reshape(N, K).T.astype(compute_dtype)     # (K, N)
    b_mat = bias.astype(jnp.float32).reshape(1, N)

    # Tile selection: multiple of 16 (bf16 sublane packing); cap so that the
    # grid has >= 2 steps whenever M allows (megacore sharding on v7x).
    tile_m = max(16, _round_up(min(int(tile_m), 1024), 16))
    if M > 16:
        tile_m = min(tile_m, _round_up(_cdiv(M, 2), 16))
    grid_m = _cdiv(M, tile_m)                                # ragged last block OK

    in_item = jnp.dtype(compute_dtype).itemsize
    out_item = jnp.dtype(out_dtype).itemsize

    # VMEM: double-buffered patches + output tiles, resident weight/bias,
    # plus headroom for internal scratch.
    vmem_bytes = (2 * tile_m * K * in_item
                  + 2 * K * N * in_item
                  + 2 * N * 4
                  + 2 * tile_m * N * out_item)
    vmem_limit = int(min(max(2 * vmem_bytes + (4 << 20), 16 << 20), 96 << 20))

    cost = pl.CostEstimate(
        flops=2 * M * K * N,
        transcendentals=0,
        bytes_accessed=(M * K * in_item + K * N * in_item + N * 4
                        + M * N * out_item),
    )

    out = pl.pallas_call(
        _patch_embed_kernel,
        out_shape=jax.ShapeDtypeStruct((M, N), out_dtype),
        grid_spec=pltpu.PrefetchScalarGridSpec(
            num_scalar_prefetch=0,
            grid=(grid_m,),
            in_specs=[
                pl.BlockSpec((tile_m, K), lambda i: (i, 0)),   # stream M tiles
                pl.BlockSpec((K, N), lambda i: (0, 0)),        # weight: VMEM-resident
                pl.BlockSpec((1, N), lambda i: (0, 0)),        # bias: VMEM-resident
            ],
            out_specs=pl.BlockSpec((tile_m, N), lambda i: (i, 0)),
        ),
        compiler_params=pltpu.CompilerParams(
            dimension_semantics=("parallel",),
            vmem_limit_bytes=vmem_limit,
        ),
        cost_estimate=cost,
    )(patches, w_mat, b_mat)

    return out.reshape(B, Ho * Wo, N)                        # free view reshape


class PatchEmbedPallas:
    """JAX/Pallas mirror of the PyTorch PatchEmbed module (norm_layer=None)."""

    def __init__(self, img_size=16, patch_size=4, in_chans=4, embed_dim=32,
                 norm_layer=None, key=None, compute_dtype=jnp.bfloat16,
                 out_dtype=jnp.float32):
        self.img_size = (img_size, img_size)
        self.patch_size = (patch_size, patch_size)
        self.patches_resolution = [img_size // patch_size, img_size // patch_size]
        self.num_patches = self.patches_resolution[0] * self.patches_resolution[1]
        self.in_chans = in_chans
        self.embed_dim = embed_dim
        self.compute_dtype = compute_dtype
        self.out_dtype = out_dtype
        # TODO(synk): norm_layer (LayerNorm over embed_dim) not wired in; default is None.
        assert norm_layer is None

        if key is None:
            key = jax.random.PRNGKey(0)
        kw, kb = jax.random.split(key)
        fan_in = in_chans * patch_size * patch_size
        bound = 1.0 / jnp.sqrt(fan_in)
        self.weight = jax.random.uniform(
            kw, (embed_dim, in_chans, patch_size, patch_size),
            minval=-bound, maxval=bound, dtype=jnp.float32)
        self.bias = jax.random.uniform(
            kb, (embed_dim,), minval=-bound, maxval=bound, dtype=jnp.float32)

    def __call__(self, x):
        B, C, H, W = x.shape
        assert H == self.img_size[0] and W == self.img_size[1], (
            f"Input image size ({H}*{W}) doesn't match model "
            f"({self.img_size[0]}*{self.img_size[1]}).")
        return patch_embed(x, self.weight, self.bias,
                           patch_size=self.patch_size,
                           compute_dtype=self.compute_dtype,
                           out_dtype=self.out_dtype)


def _reference_conv_f32(x, weight, bias, patch_size):
    # Pure-JAX f32 reference: strided conv via lax.conv_general_dilated.
    y = jax.lax.conv_general_dilated(
        x, weight, window_strides=patch_size, padding="VALID",
        dimension_numbers=("NCHW", "OIHW", "NCHW"))
    y = y + bias.reshape(1, -1, 1, 1)
    B, E, Ho, Wo = y.shape
    return y.reshape(B, E, Ho * Wo).transpose(0, 2, 1)


def _reference_bf16(x, weight, bias, patch_size):
    # Reference with the same bf16-input / f32-accumulate numerics as the kernel.
    B, C, H, W = x.shape
    ph, pw = patch_size
    Ho, Wo = H // ph, W // pw
    N = weight.shape[0]
    p = x.reshape(B, C, Ho, ph, Wo, pw).transpose(0, 2, 4, 1, 3, 5)
    p = p.reshape(B * Ho * Wo, C * ph * pw).astype(jnp.bfloat16)
    w = weight.reshape(N, -1).T.astype(jnp.bfloat16)
    out = jnp.dot(p, w, preferred_element_type=jnp.float32) + bias.reshape(1, N)
    return out.reshape(B, Ho * Wo, N)


if __name__ == "__main__":
    key = jax.random.PRNGKey(0)
    kx, kp = jax.random.split(key)

    B, C, H, W = 2, 4, 16, 16
    patch, embed = 4, 32

    x = jax.random.normal(kx, (B, C, H, W), dtype=jnp.float32)

    mod = PatchEmbedPallas(img_size=H, patch_size=patch, in_chans=C,
                           embed_dim=embed, key=kp)

    out = mod(x)
    out = jax.block_until_ready(out)

    assert out.shape == (B, (H // patch) * (W // patch), embed), out.shape

    # Tight check against a reference with matched bf16-input numerics.
    ref_bf16 = _reference_bf16(x, mod.weight, mod.bias, mod.patch_size)
    assert jnp.allclose(out, ref_bf16, atol=1e-4, rtol=1e-4), (
        float(jnp.max(jnp.abs(out - ref_bf16))))

    # Looser end-to-end check against the full-f32 conv reference.
    ref_f32 = _reference_conv_f32(x, mod.weight, mod.bias, mod.patch_size)
    assert jnp.allclose(out, ref_f32, atol=5e-2, rtol=5e-2), (
        float(jnp.max(jnp.abs(out - ref_f32))))

    print("KERNEL_OK")
</pallas_src>

<mosaic_0001>
module attributes {stable_mosaic.version = 11 : i64} {
  func.func @_patch_embed_kernel(%arg0: i32, %arg1: memref<16x64xbf16, #tpu.memory_space<vmem>>, %arg2: memref<64x32xbf16, #tpu.memory_space<vmem>>, %arg3: memref<1x32xf32, #tpu.memory_space<vmem>>, %arg4: memref<16x32xf32, #tpu.memory_space<vmem>>) attributes {dimension_semantics = [#tpu.dimension_semantics<parallel>], iteration_bounds = array<i64: 2>, scalar_prefetch = 0 : i64, scratch_operands = 0 : i64, tpu.core_type = #tpu.core_type<tc>, window_params = [{transform_indices = @transform_0, window_bounds = array<i64: 16, 64>}, {pipeline_mode = #tpu.pipeline_mode<synchronous>, transform_indices = @transform_1, window_bounds = array<i64: 64, 32>}, {pipeline_mode = #tpu.pipeline_mode<synchronous>, transform_indices = @transform_2, window_bounds = array<i64: 1, 32>}, {transform_indices = @transform_3, window_bounds = array<i64: 16, 32>}]} {
    %c0 = arith.constant 0 : index
    %c0_0 = arith.constant 0 : index
    %0 = vector.load %arg1[%c0, %c0_0] : memref<16x64xbf16, #tpu.memory_space<vmem>>, vector<16x64xbf16>
    %c0_1 = arith.constant 0 : index
    %c0_2 = arith.constant 0 : index
    %1 = vector.load %arg2[%c0_1, %c0_2] : memref<64x32xbf16, #tpu.memory_space<vmem>>, vector<64x32xbf16>
    %cst = arith.constant dense<0.000000e+00> : vector<16x32xf32>
    %2 = tpu.matmul %0, %1, %cst {dimension_numbers = #tpu.dot_dimension_numbers<[1], [0], [0], [1], [0, 0, 1, 1], [], []>} : vector<16x64xbf16>, vector<64x32xbf16>, vector<16x32xf32> -> vector<16x32xf32>
    %c0_3 = arith.constant 0 : index
    %c0_4 = arith.constant 0 : index
    %3 = vector.load %arg3[%c0_3, %c0_4] : memref<1x32xf32, #tpu.memory_space<vmem>>, vector<1x32xf32>
    %4 = vector.broadcast %3 : vector<1x32xf32> to vector<16x32xf32>
    %5 = arith.addf %2, %4 : vector<16x32xf32>
    %c0_5 = arith.constant 0 : index
    %c0_6 = arith.constant 0 : index
    %6 = vector.load %arg4[%c0_5, %c0_6] : memref<16x32xf32, #tpu.memory_space<vmem>>, vector<16x32xf32>
    tpu.vector_store %arg4[%c0_5, %c0_6], %5 {strides = array<i32>} : memref<16x32xf32, #tpu.memory_space<vmem>>, vector<16x32xf32>,
    return
  }
  func.func @transform_0(%arg0: i32) -> (i32, i32) {
    %c0_i32 = arith.constant 0 : i32
    %c0_i32_0 = arith.constant 0 : i32
    return %arg0, %c0_i32 : i32, i32
  }
  func.func @transform_1(%arg0: i32) -> (i32, i32) {
    %c0_i32 = arith.constant 0 : i32
    %c0_i32_0 = arith.constant 0 : i32
    %c0_i32_1 = arith.constant 0 : i32
    return %c0_i32, %c0_i32_0 : i32, i32
  }
  func.func @transform_2(%arg0: i32) -> (i32, i32) {
    %c0_i32 = arith.constant 0 : i32
    %c0_i32_0 = arith.constant 0 : i32
    %c0_i32_1 = arith.constant 0 : i32
    return %c0_i32, %c0_i32_0 : i32, i32
  }
  func.func @transform_3(%arg0: i32) -> (i32, i32) {
    %c0_i32 = arith.constant 0 : i32
    %c0_i32_0 = arith.constant 0 : i32
    return %arg0, %c0_i32 : i32, i32
  }
}

</mosaic_0001>

<bundles_post_ra>
// kernel: patch_embed.1
= control target key start
LH: loop header
LB: loop body
LE: loop exit
PB: predicated region body
PF: predicated region fallthrough
CT: control target
= control target key end

     0   :  { %8 = vsyncpa [#allocation3], 0  ;;  %s631_s0 = inlined_call_operand.vmem [shape: bf16[32,64], index: 0, kind: input, shape index: {}]   ;;  %s632_s1 = inlined_call_operand.vmem [shape: bf16[64,32], index: 1, kind: input, shape index: {}]   ;;  %s633_s2 = inlined_call_operand.vmem [shape: f32[1,32], index: 2, kind: input, shape index: {}]   ;;  %s634_s3 = inlined_call_operand.hbm [shape: f32[32,32], index: 3, kind: output, shape index: {}]  }
   0x1   :  { %10 = vsyncpa [#allocation3 + $0x1], 0  ;;  %s515_s12 = smov 0   ;;  %s517_s13 = smov 0  }
   0x2   :  { %s519_s14 = smov 0   ;;  %s521_s15 = smov 0  }
   0x3 LB: > { %s536_s16 = sadd.s32 4294967295, %s488_s15   ;;  %s343_s17 = sadd.s32 4294967294, %s488_s15   ;;  %s488_s15 = sphi %s521_s15, %s640_s15   ;;  %s484_s14 = sphi %s519_s14, %s639_s14   ;;  %s480_s13 = sphi %s517_s13, %s638_s13   ;;  %s476_s12 = sphi %s515_s12, %s637_s12  }
   0x4   : > { %s540_s18 = sadd.s32 1, %s488_s15   ;;  %s91_s19 = sadd.s32 1, %s484_s14 }
   0x5   : > { %s88_s20 = ssub.s32 %s488_s15, %s540_s18  ;;  %p101_p0 = scmp.ne.s32.totalorder %s484_s14, %s480_s13 }
   0x6   : > { %p89_p1 = scmp.eq.s32.totalorder %s88_s20, 0  ;;  %p102_p2 = scmp.eq.s32.totalorder %s536_s16, 1 }
   0x7   : > { %p107_p3 = scmp.ne.s32.totalorder %s480_s13, %s476_s12  ;;  %p108_p4 = scmp.eq.s32.totalorder %s343_s17, 1 }
   0x8   : > { %s551_s21 = scalar_select %p89_p1, %s484_s14, %s91_s19  }
   0x9   : > { %p553_p5 = por %p102_p2, %p101_p0  ;;  %p557_p6 = por %p108_p4, %p107_p3 }
   0xa   : > { %p346_p7 = scmp.ge.s32.totalorder %s488_s15, 1  ;;  %p141_p8 = scmp.lt.s32.totalorder %s488_s15, 3 }
   0xc   : > { %p142_p9 = pnand %p346_p7, %p141_p8 }
   0xd   : > { %s348_s28 = sshll.u32 (!%p142_p9), %s536_s16, 1  ;;  %s162_s10 = sand.u32 (!%p142_p9), 1, %s480_s13  }
   0xe   : > { %145 = sbr.rel (%p142_p9) target bundleno = 249 (0xf9), region = 32  ;;  %p166_p10 = scmp.lt.s32.totalorder (!%p142_p9), %s348_s28, 3 }
   0xf   : > { %s347_s11 = sshll.u32 (!%p142_p9), %s162_s10, 4  ;;  %s362_s25 = sshll.u32 (!%p142_p9), %s536_s16, 8 }
  0x10   : > { %s164_s20 = scalar_lea.vmem (!%p142_p9), [#allocation2], %s347_s11  ;;  %s591_s29 = scalar_lea.sflag (!%p142_p9), [#allocation3], %s162_s10 }
  0x11   : > { %s281_s24 = sshll.u32 (!%p142_p9), %s164_s20, 4  ;;  %s492_s16 = smov (!%p142_p9), [#allocation2]   ;;  %s584_s24 = int_to_ptr.vmem [resolvable:$true] %s281_s24 }
  0x12   : > { %s428_s30 = scalar_lea.vmem (!%p142_p9), %s584_s24, 256 }
  0x13   : > { %v423_v0 = vld [vmem:[%s632_s1 + $0x18] sm:$0xff]   ;;  %v490_v1 = vmov 0.0   ;;  %v424_v2 = vld [vmem:[%s632_s1 + $0x10] sm:$0xff]   ;;  %vm491_vm0 = vmmov 0   ;;  %s642_s28 = smov (!%p166_p10, %s348_s28), 3  ;;  %v425_v3 = vld [vmem:[%s632_s1 + $0x8] sm:$0xff]   ;;  %p429_p11 = scmp.ne.s32.totalorder %s584_s24, %s428_s30 }
  0x14   : > { %368 = vmatprep.subr.bf16.mxu0 %v490_v1  ;;  %376 = vmatprep.mubr.msk.bf16.mxu0 %vm491_vm0, %v490_v1  ;;  %s349_s4 = sshll.u32 %s642_s28, 2  ;;  %v426_v4 = vld [vmem:[%s632_s1] sm:$0xff]   ;;  %vm219_vm1 = vcmask 523264   ;;  %vm264_vm2 = vcmask 261120   ;;  %s589_s28 = scalar_lea.hbm %s634_s3, %s362_s25 }
  0x15   : > { %369 = vmatpush3.bf16.msra.mxu0 %v423_v0  ;;  %s169_s7 = scalar_lea.vmem %s631_s0, %s349_s4  ;;  %v350_v6 = vld [vmem:[%s633_s2] ss:$0 sm:$0xff]  ;;  %p430_p12 = pnand %p429_p11, %p553_p5 }
  0x16   : > { %370 = vmatprep.subr.bf16.mxu0 %v490_v1  ;;  %v427_v5 = vld [vmem:[%s169_s7] sm:$0xff]   ;;  %s432_s4 = sshll.u32 %s492_s16, 4  ;;  %s433_s4 = int_to_ptr.vmem [resolvable:$false] %s432_s4 }
  0x17   : > { %p431_p13 = pneg %p430_p12  ;;  %s434_s5 = scalar_lea.vmem %s433_s4, 512 }
  0x18   : > { %p435_p0 = scmp.lt.s32.totalorder %s584_s24, %s433_s4  ;;  %p436_p1 = scmp.lt.s32.totalorder %s434_s5, %s428_s30 }
  0x19   : > { %371 = vmatpush3.bf16.msra.mxu0 %v424_v2 }
  0x1a   : > { %372 = vmatprep.subr.bf16.mxu0 %v490_v1  ;;  %p437_p2 = por %p436_p1, %p435_p0 }
  0x1c   : > { %p438_p3 = pnand %p437_p2, %p431_p13 }
  0x1d   : > { %373 = vmatpush3.bf16.msra.mxu0 %v425_v3 }
  0x1e   : > { %374 = vmatprep.subr.bf16.mxu0 %v490_v1 }
  0x21   : > { %375 = vmatpush3.bf16.msra.mxu0 %v426_v4 }
  0x24   : > { %377 = vmatmul.mubr.msk.bf16.vlgmr.msra.gmra.mxu0 %vm219_vm1, %v427_v5 }
  0xe4   : > { %v257_v7 = vpop.f32.mrf.mxu0 }
  0xe5   : > { %v258_v8 = vadd.f32 %v350_v6, %v257_v7 }
  0xe6   : > { %v378_v9 = vpop.f32.mrf.mxu0 }
  0xe7   : > { %265 = vst.msk [vmem:[%s164_s20] sm:$0xff] %vm264_vm2, %v258_v8 }
  0xe8   : > { %v260_v10 = vpop.f32.mrf.mxu0 }
  0xe9   : > { %v261_v11 = vadd.f32 %v350_v6, %v260_v10 }
  0xea   : > { %v379_v12 = vpop.f32.mrf.mxu0 }
  0xeb   : > { %266 = vst.msk [vmem:[%s164_s20 + $0x8] sm:$0xff] %vm264_vm2, %v261_v11 }
  0xec   : > { %441 = shalt.err (!%p438_p3)
}
  0xed   : > { %s442_s6 = scalar_lea.hbm %s589_s28, 256  ;;  %s446_s9 = scalar_lea.hbm %s634_s3, 512 }
  0xee   : > { %p443_p4 = scmp.ne.s32.totalorder %s589_s28, %s442_s6  ;;  %p447_p9 = scmp.lt.s32.totalorder %s589_s28, %s634_s3 }
  0xef   : > { %p448_p10 = scmp.lt.s32.totalorder %s446_s9, %s442_s6 }
  0xf0   : > { %p444_p7 = pnand %p443_p4, %p553_p5 }
  0xf1   : > { %p449_p11 = por %p448_p10, %p447_p9 }
  0xf2   : > { %p445_p8 = pneg %p444_p7 }
  0xf4   : > { %p450_p12 = pnand %p449_p11, %p445_p8 }
  0xf6   : > { %453 = shalt.err (!%p450_p12)
}
  0xf7   : > { %s493_s17 = smov 128   ;;  %s494_s19 = smov 8  }
  0xf8   : > { %380 = dma.vmem_to_hbm [thread:$0]  (%p553_p5), %s584_s24, 256, %s589_s28, %s591_s29, %s493_s17, %s493_s17, %s494_s19  }
  0xf9 PF: > { %p386_p13 = scmp.ge.s32.totalorder %s488_s15, 2  ;;  %s296_s20 = sand.u32 1, %s476_s12  }
  0xfa   : > { %s297_s25 = scalar_lea.sflag [#allocation3], %s296_s20 }
  0xfb   : > { %p383_p0 = pnand %p386_p13, %p557_p6 }
  0xfd   : > { %p384_p1 = pneg %p383_p0 }
  0xff   : > { %471 = dma.done.wait (%p384_p1), %s297_s25, 256  }
 0x100   : > { %473 = vsyncadd (%p384_p1), %s297_s25, 4294967040  ;;  %p13_p2 = scmp.ge.s32.totalorder %s540_s18, 4   ;;  %s637_s12 = smov %s480_s13 }
 0x101   : > { %s638_s13 = smov %s484_s14  ;;  %s639_s14 = smov %s551_s21 }
 0x102   : > { %s640_s15 = smov %s540_s18  ;;  %15 = sbr.rel (!%p13_p2) target bundleno = 3 (0x3), region = 67 }
 0x107   :  { %302 = vsyncpa [#allocation3], 1 }
 0x108   :  { %304 = vsyncpa [#allocation3 + $0x1], 1 }

</bundles_post_ra>
